<compile_context>
chip_gen: v5e
topology: v5e:2x2
jax: 0.10.0
libtpu: 0.0.40
codegen_flags: <defaults>
</compile_context>

<pallas_src>
import functools

import jax
import jax.numpy as jnp
from jax import lax
from jax.experimental import pallas as pl
from jax.experimental.pallas import tpu as pltpu


# ---------------------------------------------------------------------------
# tiling helpers
# ---------------------------------------------------------------------------
def _round_up(x, m):
    return ((x + m - 1) // m) * m


def _tile(dim, preferred, align):
    """Full dim if small, otherwise the largest `align` multiple <= preferred."""
    if dim <= preferred:
        return dim
    return max((preferred // align) * align, align)


def _divisor_tile(dim, preferred, align):
    """Largest align-multiple <= preferred that divides dim exactly (no ragged
    edge); falls back to _tile (masked partial blocks) if none exists."""
    if dim <= preferred:
        return dim
    t = (preferred // align) * align
    while t >= align:
        if dim % t == 0:
            return t
        t -= align
    return _tile(dim, preferred, align)


def _seq_tile(seq_len):
    """Shared q/kv block size: small sequences -> one 8-aligned block; large
    sequences -> 512 (sequence is padded to a multiple, padded keys masked)."""
    if seq_len <= 512:
        return _round_up(seq_len, 8)
    return 512


# ---------------------------------------------------------------------------
# kernel 1: fused QKV projection, output written head-split (3*nH, N, hd) bf16
# ---------------------------------------------------------------------------
def qkv_proj_kernel(x_ref, w_ref, b_ref, o_ref):
    # x: (tm, din) f32 ; w: (1, din, hd) f32 ; b: (1, 1, hd) f32 ; o: (1, tm, hd) bf16
    x = x_ref[...].astype(jnp.bfloat16)
    w = w_ref[0].astype(jnp.bfloat16)
    acc = jnp.dot(x, w, preferred_element_type=jnp.float32)
    o_ref[0] = (acc + b_ref[0]).astype(o_ref.dtype)


def qkv_projection(x2d, w_qkv, b_qkv, num_heads, scale):
    N, din = x2d.shape
    C = w_qkv.shape[1] // 3
    hd = C // num_heads
    nslots = 3 * num_heads
    # parameter-only relayout: column j = t*C + h*hd + c -> slot (t*nH + h).
    # Softmax scale folded into the Q slots (weights AND bias).
    w3 = w_qkv.reshape(din, 3, num_heads, hd).transpose(1, 2, 0, 3)
    b3 = b_qkv.reshape(3, num_heads, 1, hd)
    qscale = jnp.array([scale, 1.0, 1.0], jnp.float32).reshape(3, 1, 1, 1)
    w3 = (w3 * qscale).reshape(nslots, din, hd)
    b3 = (b3 * qscale).reshape(nslots, 1, hd)

    tm = _tile(N, 1024, 8)                 # large row tile -> fewer weight re-reads
    grid = (pl.cdiv(N, tm), nslots)        # slots innermost: x tile is not re-fetched
    return pl.pallas_call(
        qkv_proj_kernel,
        out_shape=jax.ShapeDtypeStruct((nslots, N, hd), jnp.bfloat16),
        grid=grid,
        in_specs=[
            pl.BlockSpec((tm, din), lambda i, j: (i, 0)),
            pl.BlockSpec((1, din, hd), lambda i, j: (j, 0, 0)),
            pl.BlockSpec((1, 1, hd), lambda i, j: (j, 0, 0)),
        ],
        out_specs=pl.BlockSpec((1, tm, hd), lambda i, j: (j, i, 0)),
        compiler_params=pltpu.CompilerParams(
            dimension_semantics=("parallel", "parallel")),
    )(x2d, w3, b3)   # slots: [q heads..., k heads..., v heads...]


# ---------------------------------------------------------------------------
# kernel 2: q-tiled flash attention with merged in-kernel rel-pos bias
# ---------------------------------------------------------------------------
def attn_kernel(q_ref, k_ref, v_ref, rel_ref, e_ref, o_ref, m_sc, l_sc, acc_sc,
                *, kv_tile, valid_len):
    kv = pl.program_id(3)

    @pl.when(kv == 0)
    def _init():
        m_sc[...] = jnp.full_like(m_sc, -jnp.inf)
        l_sc[...] = jnp.zeros_like(l_sc)
        acc_sc[...] = jnp.zeros_like(acc_sc)

    q = q_ref[0, 0]                       # (tq, hd)  bf16, scale already folded in
    k = k_ref[0, 0]                       # (tk, hd)  bf16
    v = v_ref[0, 0]                       # (tk, hd)  bf16

    # scores: contract last dims directly (no materialized k transpose)
    s = lax.dot_general(q, k, dimension_numbers=(((1,), (1,)), ((), ())),
                        preferred_element_type=jnp.float32)           # (tq, tk)
    # merged decomposed rel-pos bias: one K=(H+W) matmul per key block
    s = s + jnp.dot(rel_ref[0, 0], e_ref[...],
                    preferred_element_type=jnp.float32)

    if valid_len is not None:             # only emitted when the sequence is padded
        col = kv * kv_tile + lax.broadcasted_iota(jnp.int32, s.shape, 1)
        s = jnp.where(col < valid_len, s, -jnp.inf)

    # online softmax; element-wise math in f32, m/l kept lane-broadcast (tq, 128)
    m_prev = m_sc[...]
    m_new = jnp.maximum(m_prev, jnp.max(s, axis=-1, keepdims=True))
    alpha = jnp.exp(m_prev - m_new)
    p = jnp.exp(s - m_new[:, :1])
    l_sc[...] = alpha * l_sc[...] + jnp.sum(p, axis=-1, keepdims=True)
    acc_sc[...] = alpha[:, :1] * acc_sc[...] + jnp.dot(
        p.astype(v.dtype), v, preferred_element_type=jnp.float32)
    m_sc[...] = m_new

    @pl.when(kv == pl.num_programs(3) - 1)
    def _finalize():
        inv_l = pl.reciprocal(l_sc[:, :1], approx=True)   # EUP, deferred normalization
        o_ref[0, 0] = (acc_sc[...] * inv_l).astype(o_ref.dtype)


def attention_core(qkv4, rel, e_mat, *, num_heads, seq_valid, tile):
    nH = num_heads
    _, B, Sp, hd = qkv4.shape
    HW = e_mat.shape[0]
    nq = Sp // tile
    nkv = Sp // tile
    kernel = functools.partial(
        attn_kernel, kv_tile=tile,
        valid_len=(seq_valid if Sp != seq_valid else None))
    return pl.pallas_call(
        kernel,
        out_shape=jax.ShapeDtypeStruct((nH, B, Sp, hd), jnp.bfloat16),
        grid=(nH, B, nq, nkv),                                  # kv reduction last
        in_specs=[
            pl.BlockSpec((1, 1, tile, hd), lambda h, b, qi, kv: (h, b, qi, 0)),        # q
            pl.BlockSpec((1, 1, tile, hd), lambda h, b, qi, kv: (nH + h, b, kv, 0)),   # k
            pl.BlockSpec((1, 1, tile, hd), lambda h, b, qi, kv: (2 * nH + h, b, kv, 0)),  # v
            pl.BlockSpec((1, 1, tile, HW), lambda h, b, qi, kv: (h, b, qi, 0)),        # rel
            pl.BlockSpec((HW, tile), lambda h, b, qi, kv: (0, kv)),                    # E
        ],
        out_specs=pl.BlockSpec((1, 1, tile, hd), lambda h, b, qi, kv: (h, b, qi, 0)),
        scratch_shapes=[
            pltpu.VMEM((tile, 128), jnp.float32),   # running max (lane-broadcast)
            pltpu.VMEM((tile, 128), jnp.float32),   # running sum (lane-broadcast)
            pltpu.VMEM((tile, hd), jnp.float32),    # output accumulator
        ],
        compiler_params=pltpu.CompilerParams(
            dimension_semantics=("parallel", "parallel", "parallel", "arbitrary")),
    )(qkv4, qkv4, qkv4, rel, e_mat)


# ---------------------------------------------------------------------------
# kernel 3: output projection, `groups` heads contracted per reduction step
# ---------------------------------------------------------------------------
def proj_kernel(a_ref, w_ref, b_ref, o_ref, acc_ref, *, groups):
    g = pl.program_id(2)

    @pl.when(g == 0)
    def _zero():
        acc_ref[...] = jnp.zeros_like(acc_ref)

    acc = acc_ref[...]
    for gg in range(groups):                                     # static unroll
        acc = acc + jnp.dot(a_ref[gg], w_ref[gg].astype(jnp.bfloat16),
                            preferred_element_type=jnp.float32)
    acc_ref[...] = acc

    @pl.when(g == pl.num_programs(2) - 1)
    def _store():
        o_ref[...] = (acc_ref[...] + b_ref[...]).astype(o_ref.dtype)


def output_projection(attn_out, w_proj, b_proj):
    nH, N, hd = attn_out.shape
    C = w_proj.shape[1]
    wR = w_proj.reshape(nH, hd, C)        # merged channel = h*hd + c (row-major split)
    b2 = b_proj.reshape(1, C)
    groups = next(g for g in (4, 2, 1) if nH % g == 0)
    tm = _divisor_tile(N, 512, 8)
    tn = _divisor_tile(C, 768, 128)       # exact divisor -> lane-dense, no ragged edge
    grid = (pl.cdiv(N, tm), pl.cdiv(C, tn), nH // groups)
    kernel = functools.partial(proj_kernel, groups=groups)
    return pl.pallas_call(
        kernel,
        out_shape=jax.ShapeDtypeStruct((N, C), jnp.float32),
        grid=grid,
        in_specs=[
            pl.BlockSpec((groups, tm, hd), lambda i, j, g: (g, i, 0)),
            pl.BlockSpec((groups, hd, tn), lambda i, j, g: (g, 0, j)),
            pl.BlockSpec((1, tn), lambda i, j, g: (0, j)),
        ],
        out_specs=pl.BlockSpec((tm, tn), lambda i, j, g: (i, j)),
        scratch_shapes=[pltpu.VMEM((tm, tn), jnp.float32)],
        compiler_params=pltpu.CompilerParams(
            dimension_semantics=("parallel", "parallel", "arbitrary")),
    )(attn_out, wR, b2)


# ---------------------------------------------------------------------------
# glue (parameter precompute + tiny per-query rel-pos einsums)
# ---------------------------------------------------------------------------
def get_rel_pos_jax(q_size, k_size, rel_pos):
    max_rel_dist = int(2 * max(q_size, k_size) - 1)
    if rel_pos.shape[0] != max_rel_dist:
        # TODO(synk): jax.image.resize('linear') matches F.interpolate(align_corners=False)
        # for upsampling; it applies antialiasing on downsampling which torch does not.
        rel_pos_resized = jax.image.resize(
            rel_pos, (max_rel_dist, rel_pos.shape[1]), method="linear")
    else:
        rel_pos_resized = rel_pos
    q_coords = jnp.arange(q_size)[:, None] * max(k_size / q_size, 1.0)
    k_coords = jnp.arange(k_size)[None, :] * max(q_size / k_size, 1.0)
    rc = (q_coords - k_coords + (k_size - 1) * max(q_size / k_size, 1.0)).astype(jnp.int32)
    return rel_pos_resized[rc]            # (q_size, k_size, head_dim)


def attention_forward(x, params, num_heads):
    B, H, W, C = x.shape
    S = H * W
    hd = C // num_heads
    scale = hd ** -0.5
    nH = num_heads

    # 1) fused QKV projection (scale folded into the q slots) -> (3*nH, B*S, hd) bf16
    qkv3 = qkv_projection(x.reshape(B * S, C), params["w_qkv"], params["b_qkv"],
                          num_heads, scale)
    qkv4 = qkv3.reshape(3 * nH, B, S, hd)

    # 2) decomposed rel-pos glue: per-query tables (nH,B,S,H+W); the SxS
    #    expansion happens in-kernel via one constant 0/1 matmul per key block.
    #    q is already scaled, so 1/scale is folded into Rh/Rw.
    Rh = get_rel_pos_jax(H, H, params["rel_pos_h"]) * (1.0 / scale)   # (H, H, hd)
    Rw = get_rel_pos_jax(W, W, params["rel_pos_w"]) * (1.0 / scale)   # (W, W, hd)
    q_heads = qkv4[:nH].reshape(nH, B, H, W, hd)
    rel_h = jnp.einsum("nbhwc,hkc->nbhwk", q_heads, Rh)
    rel_w = jnp.einsum("nbhwc,wkc->nbhwk", q_heads, Rw)
    rel = jnp.concatenate([rel_h, rel_w], axis=-1).reshape(nH, B, S, H + W)
    rel = rel.astype(jnp.bfloat16)
    eh = jnp.kron(jnp.eye(H, dtype=jnp.float32), jnp.ones((1, W), jnp.float32))  # (H, S)
    ew = jnp.tile(jnp.eye(W, dtype=jnp.float32), (1, H))                          # (W, S)
    e_mat = jnp.concatenate([eh, ew], axis=0).astype(jnp.bfloat16)                # (H+W, S)

    # 3) pad the sequence to a multiple of the q/kv tile (padded keys are masked
    #    in-kernel; padded query rows are sliced off afterwards)
    tile = _seq_tile(S)
    Sp = _round_up(S, tile)
    if Sp != S:
        pad = Sp - S
        qkv4 = jnp.pad(qkv4, ((0, 0), (0, 0), (0, pad), (0, 0)))
        rel = jnp.pad(rel, ((0, 0), (0, 0), (0, pad), (0, 0)))
        e_mat = jnp.pad(e_mat, ((0, 0), (0, pad)))

    # 4) q-tiled flash attention with in-kernel bias expansion -> (nH, B, Sp, hd) bf16
    attn_out = attention_core(qkv4, rel, e_mat, num_heads=nH, seq_valid=S, tile=tile)
    attn_out = attn_out[:, :, :S, :].reshape(nH, B * S, hd)

    # 5) output projection, grouped head reduction folded into BlockSpecs -> (B*S, C)
    y = output_projection(attn_out, params["w_proj"], params["b_proj"])
    return y.reshape(B, H, W, C)


# ---------------------------------------------------------------------------
# pure-JAX f32 reference (mirrors the PyTorch forward exactly)
# ---------------------------------------------------------------------------
def reference_forward(x, params, num_heads):
    B, H, W, C = x.shape
    S = H * W
    hd = C // num_heads
    scale = hd ** -0.5

    qkv = x.reshape(B, S, C) @ params["w_qkv"] + params["b_qkv"]
    qkv = qkv.reshape(B, S, 3, num_heads, hd).transpose(2, 0, 3, 1, 4)
    qkv = qkv.reshape(3, B * num_heads, S, hd)
    q, k, v = qkv[0], qkv[1], qkv[2]

    attn = (q * scale) @ jnp.swapaxes(k, -1, -2)
    Rh = get_rel_pos_jax(H, H, params["rel_pos_h"])
    Rw = get_rel_pos_jax(W, W, params["rel_pos_w"])
    r_q = q.reshape(B * num_heads, H, W, hd)
    rel_h = jnp.einsum("bhwc,hkc->bhwk", r_q, Rh)
    rel_w = jnp.einsum("bhwc,wkc->bhwk", r_q, Rw)
    attn = (attn.reshape(B * num_heads, H, W, H, W)
            + rel_h[:, :, :, :, None]
            + rel_w[:, :, :, None, :]).reshape(B * num_heads, S, S)
    attn = jax.nn.softmax(attn, axis=-1)
    out = (attn @ v).reshape(B, num_heads, H, W, hd).transpose(0, 2, 3, 1, 4)
    out = out.reshape(B, S, C)
    y = out @ params["w_proj"] + params["b_proj"]
    return y.reshape(B, H, W, C)


# ---------------------------------------------------------------------------
if __name__ == "__main__":
    B, H, W, dim, num_heads = 2, 4, 4, 32, 4
    hd = dim // num_heads

    key = jax.random.PRNGKey(0)
    ks = jax.random.split(key, 7)
    params = {
        "w_qkv": jax.random.normal(ks[0], (dim, 3 * dim), jnp.float32) * 0.05,
        "b_qkv": jax.random.normal(ks[1], (3 * dim,), jnp.float32) * 0.02,
        "w_proj": jax.random.normal(ks[2], (dim, dim), jnp.float32) * 0.05,
        "b_proj": jax.random.normal(ks[3], (dim,), jnp.float32) * 0.02,
        "rel_pos_h": jax.random.normal(ks[4], (2 * H - 1, hd), jnp.float32) * 0.1,
        "rel_pos_w": jax.random.normal(ks[5], (2 * W - 1, hd), jnp.float32) * 0.1,
    }
    x = jax.random.normal(ks[6], (B, H, W, dim), jnp.float32)

    y = attention_forward(x, params, num_heads)
    y = jax.block_until_ready(y)

    y_ref = reference_forward(x, params, num_heads)
    err = float(jnp.max(jnp.abs(y - y_ref)))
    assert y.shape == (B, H, W, dim)
    # bf16 MXU operands / bf16 inter-kernel activations (f32 accumulation)
    # -> loosen tolerance vs the f32 reference.
    assert jnp.allclose(y, y_ref, atol=2e-2, rtol=2e-2), err

    print("KERNEL_OK")
</pallas_src>

<mosaic_0001>
module attributes {stable_mosaic.version = 11 : i64} {
  func.func @qkv_proj_kernel(%arg0: i32, %arg1: i32, %arg2: memref<32x32xf32, #tpu.memory_space<vmem>>, %arg3: memref<1x32x8xf32, #tpu.memory_space<vmem>>, %arg4: memref<1x1x8xf32, #tpu.memory_space<vmem>>, %arg5: memref<1x32x8xbf16, #tpu.memory_space<vmem>>) attributes {dimension_semantics = [#tpu.dimension_semantics<parallel>, #tpu.dimension_semantics<parallel>], iteration_bounds = array<i64: 1, 12>, scalar_prefetch = 0 : i64, scratch_operands = 0 : i64, tpu.core_type = #tpu.core_type<tc>, window_params = [{transform_indices = @transform_0, window_bounds = array<i64: 32, 32>}, {transform_indices = @transform_1, window_bounds = array<i64: 1, 32, 8>}, {transform_indices = @transform_2, window_bounds = array<i64: 1, 1, 8>}, {transform_indices = @transform_3, window_bounds = array<i64: 1, 32, 8>}]} {
    %c0 = arith.constant 0 : index
    %c0_0 = arith.constant 0 : index
    %0 = vector.load %arg2[%c0, %c0_0] : memref<32x32xf32, #tpu.memory_space<vmem>>, vector<32x32xf32>
    %1 = arith.truncf %0 : vector<32x32xf32> to vector<32x32xbf16>
    %c0_1 = arith.constant 0 : index
    %c0_2 = arith.constant 0 : index
    %c0_3 = arith.constant 0 : index
    %2 = vector.load %arg3[%c0_1, %c0_2, %c0_3] : memref<1x32x8xf32, #tpu.memory_space<vmem>>, vector<1x32x8xf32>
    %3 = vector.shape_cast %2 : vector<1x32x8xf32> to vector<32x8xf32>
    %4 = arith.truncf %3 : vector<32x8xf32> to vector<32x8xbf16>
    %cst = arith.constant dense<0.000000e+00> : vector<32x8xf32>
    %5 = tpu.matmul %1, %4, %cst {dimension_numbers = #tpu.dot_dimension_numbers<[1], [0], [0], [1], [0, 0, 1, 1], [], []>} : vector<32x32xbf16>, vector<32x8xbf16>, vector<32x8xf32> -> vector<32x8xf32>
    %c0_4 = arith.constant 0 : index
    %c0_5 = arith.constant 0 : index
    %c0_6 = arith.constant 0 : index
    %6 = vector.load %arg4[%c0_4, %c0_5, %c0_6] : memref<1x1x8xf32, #tpu.memory_space<vmem>>, vector<1x1x8xf32>
    %7 = vector.shape_cast %6 : vector<1x1x8xf32> to vector<1x8xf32>
    %8 = vector.broadcast %7 : vector<1x8xf32> to vector<32x8xf32>
    %9 = arith.addf %5, %8 : vector<32x8xf32>
    %10 = arith.truncf %9 : vector<32x8xf32> to vector<32x8xbf16>
    %c0_7 = arith.constant 0 : index
    %c0_8 = arith.constant 0 : index
    %c0_9 = arith.constant 0 : index
    %11 = vector.load %arg5[%c0_7, %c0_8, %c0_9] : memref<1x32x8xbf16, #tpu.memory_space<vmem>>, vector<1x32x8xbf16>
    %12 = vector.shape_cast %11 : vector<1x32x8xbf16> to vector<32x8xbf16>
    %13 = vector.shape_cast %10 : vector<32x8xbf16> to vector<1x32x8xbf16>
    tpu.vector_store %arg5[%c0_7, %c0_8, %c0_9], %13 {strides = array<i32>} : memref<1x32x8xbf16, #tpu.memory_space<vmem>>, vector<1x32x8xbf16>,
    return
  }
  func.func @transform_0(%arg0: i32, %arg1: i32) -> (i32, i32) {
    %c0_i32 = arith.constant 0 : i32
    %c0_i32_0 = arith.constant 0 : i32
    return %arg0, %c0_i32 : i32, i32
  }
  func.func @transform_1(%arg0: i32, %arg1: i32) -> (i32, i32, i32) {
    %c0_i32 = arith.constant 0 : i32
    %c0_i32_0 = arith.constant 0 : i32
    %c0_i32_1 = arith.constant 0 : i32
    return %arg1, %c0_i32, %c0_i32_0 : i32, i32, i32
  }
  func.func @transform_2(%arg0: i32, %arg1: i32) -> (i32, i32, i32) {
    %c0_i32 = arith.constant 0 : i32
    %c0_i32_0 = arith.constant 0 : i32
    %c0_i32_1 = arith.constant 0 : i32
    return %arg1, %c0_i32, %c0_i32_0 : i32, i32, i32
  }
  func.func @transform_3(%arg0: i32, %arg1: i32) -> (i32, i32, i32) {
    %c0_i32 = arith.constant 0 : i32
    %c0_i32_0 = arith.constant 0 : i32
    return %arg1, %arg0, %c0_i32 : i32, i32, i32
  }
}

</mosaic_0001>

<bundles_post_ra>
// kernel: tpu_custom_call.1
= control target key start
LH: loop header
LB: loop body
LE: loop exit
PB: predicated region body
PF: predicated region fallthrough
CT: control target
= control target key end

     0   :  { %s474_s12 = smov 0   ;;  %s476_s13 = smov 0   ;;  %s527_s0 = inlined_call_operand.vmem [shape: f32[32,32], index: 0, kind: input, shape index: {}]   ;;  %s528_s1 = inlined_call_operand.vmem [shape: f32[12,32,8], index: 1, kind: input, shape index: {}]   ;;  %s529_s2 = inlined_call_operand.vmem [shape: f32[12,1,8], index: 2, kind: input, shape index: {}]   ;;  %s530_s3 = inlined_call_operand.vmem [shape: bf16[12,32,8], index: 3, kind: output, shape index: {}]  }
   0x1   :  { %s478_s14 = smov 0  }
   0x2 LB: > { %s22_s15 = sadd.s32 1, %s448_s13  ;;  %p392_p0 = scmp.ge.s32.totalorder %s452_s14, 1  ;;  %s452_s14 = sphi %s478_s14, %s13_s14   ;;  %s448_s13 = sphi %s476_s13, %s532_s13   ;;  %s444_s12 = sphi %s474_s12, %s531_s12  }
   0x3   : > { %p23_p1 = scmp.ge.s32.totalorder %s22_s15, 12  ;;  %p170_p2 = scmp.lt.s32.totalorder %s452_s14, 13 }
   0x5   : > { %s534_s15 = smov (%p23_p1, %s22_s15), 0  ;;  %p171_p3 = pnand %p392_p0, %p170_p2 }
   0x6   : > { %p212_p4 = scmp.lt.s32.totalorder (!%p171_p3), %s444_s12, 11 }
   0x7   : > { %174 = sbr.rel (%p171_p3) target bundleno = 165 (0xa5), region = 32 }
   0xc   : > { %s536_s12 = smov (!%p212_p4, %s444_s12), 11  ;;  %v231_v5 = vld [vmem:[%s527_s0] sm:$0xff]  ;;  %v232_v7 = vld [vmem:[%s527_s0 + $0x8] sm:$0xff]  ;;  %v233_v8 = vld [vmem:[%s527_s0 + $0x10] sm:$0xff]  ;;  %vm247_vm0 = vcmask 261120   ;;  %vm277_vm1 = vcmask 60416  }
   0xd   : > { %s401_s16 = sshll.u32 %s536_s12, 5  ;;  %s219_s19 = scalar_lea.vmem %s529_s2, %s536_s12  ;;  %v234_v9 = vld [vmem:[%s527_s0 + $0x18] sm:$0xff]  ;;  %v235_v10 = vpack.c.bf16 %v232_v7, %v231_v5 }
   0xe   : > { %s216_s22 = scalar_lea.vmem %s528_s1, %s401_s16  ;;  %v236_v11 = vpack.c.bf16 %v234_v9, %v233_v8  ;;  %v429_v12 = vld [vmem:[%s219_s19] ss:$0 sm:$0xff]  ;;  %s402_s4 = sshll.u32 %s536_s12, 4 }
   0xf   : > { %v239_v0 = vld [vmem:[%s216_s22 + $0x10] sm:$0xff]  ;;  %v240_v1 = vld [vmem:[%s216_s22 + $0x18] sm:$0xff]  ;;  %v237_v2 = vld [vmem:[%s216_s22] sm:$0xff]  ;;  %s228_s7 = scalar_lea.vmem %s530_s3, %s402_s4 }
  0x10   : > { %v242_v3 = vpack.c.bf16 %v240_v1, %v239_v0  ;;  %v238_v4 = vld [vmem:[%s216_s22 + $0x8] sm:$0xff] }
  0x11   : > { %v241_v6 = vpack.c.bf16 %v238_v4, %v237_v2 }
  0x12   : > { %260 = vmatpush.bf16.msra.mxu0 %v242_v3  ;;  %403 = vmatpush.bf16.msra.mxu1 %v242_v3 }
  0x16   : > { %261 = vmatpush.bf16.msra.mxu0 %v241_v6  ;;  %404 = vmatpush.bf16.msra.mxu1 %v241_v6 }
  0x19   : > { %397 = vmatmul.msk.bf16.vlgmr.msra.gmra.mxu0 %vm247_vm0, %v235_v10  ;;  %398 = vmatmul.msk.bf16.vlgmr.msra.gmra.mxu1 %vm247_vm0, %v236_v11 }
  0x96   : > { %v263_v13 = vpop.f32.mrf.mxu0  ;;  %v268_v14 = vpop.f32.mrf.mxu1 }
  0x97   : > { %v264_v15 = vadd.f32 %v429_v12, %v263_v13  ;;  %v269_v16 = vadd.f32 %v429_v12, %v268_v14 }
  0x99   : > { %v273_v17 = vpack.c.bf16 %v264_v15, %v264_v15  ;;  %v275_v18 = vpack.c.bf16 %v269_v16, %v269_v16 }
  0x9b   : > { %278 = vst.msk [vmem:[%s228_s7] sm:$0xf] %vm277_vm1, %v273_v17 }
  0x9c   : > { %280 = vst.msk [vmem:[%s228_s7 + $0x8] sm:$0xf] %vm277_vm1, %v275_v18 }
  0x9e   : > { %v265_v19 = vpop.f32.mrf.mxu0  ;;  %v270_v20 = vpop.f32.mrf.mxu1 }
  0x9f   : > { %v266_v21 = vadd.f32 %v429_v12, %v265_v19  ;;  %v271_v22 = vadd.f32 %v429_v12, %v270_v20 }
  0xa1   : > { %v274_v23 = vpack.c.bf16 %v266_v21, %v266_v21  ;;  %v276_v24 = vpack.c.bf16 %v271_v22, %v271_v22 }
  0xa3   : > { %279 = vst.msk [vmem:[%s228_s7 + $0x4] sm:$0xf] %vm277_vm1, %v274_v23 }
  0xa4   : > { %281 = vst.msk [vmem:[%s228_s7 + $0xc] sm:$0xf] %vm277_vm1, %v276_v24 }
  0xa5 PF: > { %s13_s14 = sadd.s32 1, %s452_s14   ;;  %s531_s12 = smov %s448_s13 }
  0xa6   : > { %p10_p5 = scmp.ge.s32.totalorder %s13_s14, 14   ;;  %s532_s13 = smov %s534_s15 }
  0xa8   :  { %12 = sbr.rel (!%p10_p5) target bundleno = 2 (0x2), region = 68 }

</bundles_post_ra>
